<compile_context>
chip_gen: v6e
topology: v6e:2x2x1
jax: 0.10.0
libtpu: 0.0.40
codegen_flags: <defaults>
</compile_context>

<pallas_src>
import functools

import jax
import jax.numpy as jnp
from jax import lax
from jax.experimental import pallas as pl
from jax.experimental.pallas import tpu as pltpu


def _conv_prelu_kernel(x_ref, w_ref, b_ref, alpha_ref, o_ref, *,
                       k, img_w, ncols, compute_dtype):
    """Single grid step: whole batch, one MXU dot.

    x_ref:     (Cin, Xcols)       batch folded into lanes: col b*H*W + s is
                                  sample b, flat spatial position s (plus pad).
    w_ref:     (Cout, K*K*Cin)    packed weights, column order (kh, kw, c).
    b_ref:     (Cout, 1)          bias, f32.
    alpha_ref: (1, 1)             PReLU slope (SMEM scalar).
    o_ref:     (Cout, ncols)      ncols = round_up(N*H*W, 128); dense stride-1
                                  conv outputs over flattened positions.
    """
    x = x_ref[...].astype(compute_dtype)               # (Cin, Xcols) -> bf16

    # Build the shifted patch stack once (rows ordered (kh, kw, c) to match
    # the packed weight columns), then do ONE matmul with f32 accumulation.
    rhs = jnp.concatenate(
        [x[:, kh * img_w + kw: kh * img_w + kw + ncols]
         for kh in range(k) for kw in range(k)],
        axis=0)                                         # (K*K*Cin, ncols)

    acc = jnp.dot(w_ref[...], rhs,
                  preferred_element_type=jnp.float32)   # (Cout, ncols) f32
    acc = acc + b_ref[...]                              # lane-broadcast bias
    alpha = alpha_ref[0, 0]
    acc = jnp.where(acc > 0.0, acc, alpha * acc)        # PReLU
    o_ref[...] = acc.astype(o_ref.dtype)


@functools.partial(jax.jit,
                   static_argnames=("kernel_size", "stride", "compute_dtype"))
def conv2d_prelu(x, weight, bias, alpha, *, kernel_size, stride=1,
                 compute_dtype=jnp.bfloat16):
    """Fused Conv2d (valid padding) + bias + PReLU.

    x:      (N, Cin, H, W) f32 (NCHW); weight: (Cout, Cin, K, K);
    bias:   (Cout,); alpha: scalar PReLU slope (PyTorch single-param default).
    Returns (N, Cout, Hout, Wout) f32.
    """
    n, c_in, h, w = x.shape
    c_out = weight.shape[0]
    k = kernel_size

    hd = h - k + 1                       # dense (stride-1) output extents
    wd = w - k + 1
    ho = (h - k) // stride + 1
    wo = (w - k) // stride + 1
    s = h * w
    d_max = (k - 1) * w + (k - 1)        # largest shifted-slice offset

    ncols = n * s                                        # valid flat columns
    ncols_pad = -(-ncols // 128) * 128                   # dense-lane output
    xcols = -(-(ncols_pad + d_max) // 128) * 128         # padded x columns

    # Fold batch into the lane axis: (N,Cin,S) -> (Cin, N*S) (+ tail pad so all
    # K*K shifted slices of width ncols_pad stay in bounds).
    x_lanes = x.reshape(n, c_in, s).transpose(1, 0, 2).reshape(c_in, ncols)
    x_lanes = jnp.pad(x_lanes, ((0, 0), (0, xcols - ncols)))

    # Lane-dense 2-D packed weights, column order (kh, kw, c).
    w_packed = (weight.transpose(0, 2, 3, 1)
                      .reshape(c_out, k * k * c_in)
                      .astype(compute_dtype))
    b2d = bias.reshape(c_out, 1).astype(jnp.float32)
    a_smem = jnp.reshape(alpha, (1, 1)).astype(jnp.float32)

    kernel = functools.partial(_conv_prelu_kernel, k=k, img_w=w,
                               ncols=ncols_pad, compute_dtype=compute_dtype)

    out_flat = pl.pallas_call(
        kernel,
        out_shape=jax.ShapeDtypeStruct((c_out, ncols_pad), jnp.float32),
        grid=(1,),
        in_specs=[
            pl.BlockSpec((c_in, xcols), lambda i: (0, 0)),
            pl.BlockSpec((c_out, k * k * c_in), lambda i: (0, 0)),
            pl.BlockSpec((c_out, 1), lambda i: (0, 0)),
            pl.BlockSpec(memory_space=pltpu.MemorySpace.SMEM),
        ],
        out_specs=pl.BlockSpec((c_out, ncols_pad), lambda i: (0, 0)),
        compiler_params=pltpu.CompilerParams(
            dimension_semantics=("arbitrary",)),
    )(x_lanes, w_packed, b2d, a_smem)

    # Epilogue (output-sized, leading-dim only — no lane-crossing transpose):
    # drop lane padding, fold flat columns back to (Hd, W), keep the valid
    # (strided) window, and swap the two leading dims to NCHW.
    out = out_flat[:, :ncols].reshape(c_out, n, s)[:, :, :hd * w]
    out = out.reshape(c_out, n, hd, w)[:, :, :, :wd]
    out = out[:, :, :(ho - 1) * stride + 1:stride,
                    :(wo - 1) * stride + 1:stride]
    return out.transpose(1, 0, 2, 3)


if __name__ == "__main__":
    # Module config: Conv2d(in_dim=4, out_dim=8, kernel_size=3)
    #   -> stride=1, padding=0 (same_padding=False), bn=False, NL='prelu'.
    in_dim, out_dim, ksize, stride = 4, 8, 3, 1
    n, h, w = 2, 16, 16

    key = jax.random.PRNGKey(0)
    kx, kwt, kb = jax.random.split(key, 3)

    x = jax.random.normal(kx, (n, in_dim, h, w), dtype=jnp.float32)
    fan_in = in_dim * ksize * ksize
    bound = 1.0 / (fan_in ** 0.5)
    weight = jax.random.uniform(kwt, (out_dim, in_dim, ksize, ksize),
                                minval=-bound, maxval=bound, dtype=jnp.float32)
    bias = jax.random.uniform(kb, (out_dim,), minval=-bound, maxval=bound,
                              dtype=jnp.float32)
    alpha = jnp.float32(0.25)   # nn.PReLU() default init

    out = conv2d_prelu(x, weight, bias, alpha, kernel_size=ksize,
                       stride=stride)
    out = jax.block_until_ready(out)

    # Reference: XLA conv + PReLU on the same bf16-rounded operands (the kernel
    # rounds x/weight to bf16 for the MXU and accumulates in f32).
    xr = x.astype(jnp.bfloat16).astype(jnp.float32)
    wr = weight.astype(jnp.bfloat16).astype(jnp.float32)
    ref = lax.conv_general_dilated(
        xr, wr, window_strides=(stride, stride), padding="VALID",
        dimension_numbers=("NCHW", "OIHW", "NCHW"))
    ref = ref + bias.reshape(1, out_dim, 1, 1)
    ref = jnp.where(ref > 0, ref, alpha * ref)

    assert out.shape == (n, out_dim, (h - ksize) // stride + 1,
                         (w - ksize) // stride + 1)
    assert jnp.allclose(out, ref, atol=2e-3, rtol=2e-3), \
        float(jnp.max(jnp.abs(out - ref)))

    print("KERNEL_OK")
</pallas_src>

<mosaic_0001>
module attributes {stable_mosaic.version = 11 : i64} {
  func.func @_conv_prelu_kernel(%arg0: i32, %arg1: memref<4x640xf32, #tpu.memory_space<vmem>>, %arg2: memref<8x36xbf16, #tpu.memory_space<vmem>>, %arg3: memref<8x1xf32, #tpu.memory_space<vmem>>, %arg4: memref<1x1xf32, #tpu.memory_space<smem>>, %arg5: memref<8x512xf32, #tpu.memory_space<vmem>>) attributes {dimension_semantics = [#tpu.dimension_semantics<arbitrary>], iteration_bounds = array<i64: 1>, scalar_prefetch = 0 : i64, scratch_operands = 0 : i64, tpu.core_type = #tpu.core_type<tc>, window_params = [{pipeline_mode = #tpu.pipeline_mode<synchronous>, transform_indices = @transform_0, window_bounds = array<i64: 4, 640>}, {pipeline_mode = #tpu.pipeline_mode<synchronous>, transform_indices = @transform_1, window_bounds = array<i64: 8, 36>}, {pipeline_mode = #tpu.pipeline_mode<synchronous>, transform_indices = @transform_2, window_bounds = array<i64: 8, 1>}, {transform_indices = @transform_3, window_bounds = array<i64: 1, 1>}, {pipeline_mode = #tpu.pipeline_mode<synchronous>, transform_indices = @transform_4, window_bounds = array<i64: 8, 512>}]} {
    %c0 = arith.constant 0 : index
    %c0_0 = arith.constant 0 : index
    %0 = vector.load %arg1[%c0, %c0_0] : memref<4x640xf32, #tpu.memory_space<vmem>>, vector<4x640xf32>
    %1 = arith.truncf %0 : vector<4x640xf32> to vector<4x640xbf16>
    %2 = vector.extract_strided_slice %1 {offsets = [0, 0], sizes = [4, 512], strides = [1, 1]} : vector<4x640xbf16> to vector<4x512xbf16>
    %3 = vector.extract_strided_slice %1 {offsets = [0, 1], sizes = [4, 512], strides = [1, 1]} : vector<4x640xbf16> to vector<4x512xbf16>
    %4 = vector.extract_strided_slice %1 {offsets = [0, 2], sizes = [4, 512], strides = [1, 1]} : vector<4x640xbf16> to vector<4x512xbf16>
    %5 = vector.extract_strided_slice %1 {offsets = [0, 16], sizes = [4, 512], strides = [1, 1]} : vector<4x640xbf16> to vector<4x512xbf16>
    %6 = vector.extract_strided_slice %1 {offsets = [0, 17], sizes = [4, 512], strides = [1, 1]} : vector<4x640xbf16> to vector<4x512xbf16>
    %7 = vector.extract_strided_slice %1 {offsets = [0, 18], sizes = [4, 512], strides = [1, 1]} : vector<4x640xbf16> to vector<4x512xbf16>
    %8 = vector.extract_strided_slice %1 {offsets = [0, 32], sizes = [4, 512], strides = [1, 1]} : vector<4x640xbf16> to vector<4x512xbf16>
    %9 = vector.extract_strided_slice %1 {offsets = [0, 33], sizes = [4, 512], strides = [1, 1]} : vector<4x640xbf16> to vector<4x512xbf16>
    %10 = vector.extract_strided_slice %1 {offsets = [0, 34], sizes = [4, 512], strides = [1, 1]} : vector<4x640xbf16> to vector<4x512xbf16>
    %11 = tpu.concatenate %2, %3, %4, %5, %6, %7, %8, %9, %10 in 0 : vector<4x512xbf16>, vector<4x512xbf16>, vector<4x512xbf16>, vector<4x512xbf16>, vector<4x512xbf16>, vector<4x512xbf16>, vector<4x512xbf16>, vector<4x512xbf16>, vector<4x512xbf16> -> vector<36x512xbf16>
    %c0_1 = arith.constant 0 : index
    %c0_2 = arith.constant 0 : index
    %12 = vector.load %arg2[%c0_1, %c0_2] : memref<8x36xbf16, #tpu.memory_space<vmem>>, vector<8x36xbf16>
    %cst = arith.constant dense<0.000000e+00> : vector<8x512xf32>
    %13 = tpu.matmul %12, %11, %cst {dimension_numbers = #tpu.dot_dimension_numbers<[1], [0], [0], [1], [0, 0, 1, 1], [], []>} : vector<8x36xbf16>, vector<36x512xbf16>, vector<8x512xf32> -> vector<8x512xf32>
    %c0_3 = arith.constant 0 : index
    %c0_4 = arith.constant 0 : index
    %14 = vector.load %arg3[%c0_3, %c0_4] : memref<8x1xf32, #tpu.memory_space<vmem>>, vector<8x1xf32>
    %15 = vector.broadcast %14 : vector<8x1xf32> to vector<8x512xf32>
    %16 = arith.addf %13, %15 : vector<8x512xf32>
    %c0_5 = arith.constant 0 : index
    %c0_6 = arith.constant 0 : index
    %17 = memref.load %arg4[%c0_5, %c0_6] : memref<1x1xf32, #tpu.memory_space<smem>>
    %cst_7 = arith.constant 0.000000e+00 : f32
    %18 = vector.broadcast %cst_7 : f32 to vector<8x512xf32>
    %19 = arith.cmpf ogt, %16, %18 : vector<8x512xf32>
    %20 = vector.broadcast %17 : f32 to vector<8x512xf32>
    %21 = arith.mulf %20, %16 : vector<8x512xf32>
    %22 = arith.select %19, %16, %21 : vector<8x512xi1>, vector<8x512xf32>
    %c0_8 = arith.constant 0 : index
    %c0_9 = arith.constant 0 : index
    %23 = vector.load %arg5[%c0_8, %c0_9] : memref<8x512xf32, #tpu.memory_space<vmem>>, vector<8x512xf32>
    tpu.vector_store %arg5[%c0_8, %c0_9], %22 {strides = array<i32>} : memref<8x512xf32, #tpu.memory_space<vmem>>, vector<8x512xf32>,
    return
  }
  func.func @transform_0(%arg0: i32) -> (i32, i32) {
    %c0_i32 = arith.constant 0 : i32
    %c0_i32_0 = arith.constant 0 : i32
    %c0_i32_1 = arith.constant 0 : i32
    return %c0_i32, %c0_i32_0 : i32, i32
  }
  func.func @transform_1(%arg0: i32) -> (i32, i32) {
    %c0_i32 = arith.constant 0 : i32
    %c0_i32_0 = arith.constant 0 : i32
    %c0_i32_1 = arith.constant 0 : i32
    return %c0_i32, %c0_i32_0 : i32, i32
  }
  func.func @transform_2(%arg0: i32) -> (i32, i32) {
    %c0_i32 = arith.constant 0 : i32
    %c0_i32_0 = arith.constant 0 : i32
    %c0_i32_1 = arith.constant 0 : i32
    return %c0_i32, %c0_i32_0 : i32, i32
  }
  func.func @transform_3(%arg0: i32) -> (i32, i32) {
    %c0_i32 = arith.constant 0 : i32
    %c0_i32_0 = arith.constant 0 : i32
    %c0_i32_1 = arith.constant 0 : i32
    return %c0_i32, %c0_i32_0 : i32, i32
  }
  func.func @transform_4(%arg0: i32) -> (i32, i32) {
    %c0_i32 = arith.constant 0 : i32
    %c0_i32_0 = arith.constant 0 : i32
    %c0_i32_1 = arith.constant 0 : i32
    return %c0_i32, %c0_i32_0 : i32, i32
  }
}

</mosaic_0001>

<bundles_post_ra>
// kernel: conv2d_prelu.1
= control target key start
LH: loop header
LB: loop body
LE: loop exit
PB: predicated region body
PF: predicated region fallthrough
CT: control target
= control target key end

     0   :  { %s383_s19 = smov 94   ;;  %s384_s22 = smov 111   ;;  %v390_v25 = vmov 0   ;;  %vm168_vm0 = vcmask 769024   ;;  %vm173_vm1 = vcmask 1041408   ;;  %vm123_vm2 = vcmask 900096   ;;  %s531_s0 = inlined_call_operand.vmem [shape: f32[4,640], index: 0, kind: input, shape index: {}]   ;;  %s532_s2 = inlined_call_operand.vmem [shape: f32[8,1], index: 2, kind: input, shape index: {}]   ;;  %s533_s1 = inlined_call_operand.vmem [shape: bf16[8,36], index: 1, kind: input, shape index: {}]   ;;  %s534_s3 = inlined_call_operand.<no memory space> [shape: f32[1,1], index: 3, kind: input, shape index: {}]   ;;  %s535_s4 = inlined_call_operand.vmem [shape: f32[8,512], index: 4, kind: output, shape index: {}]  }
   0x1   :  { %v20_v0 = vld [vmem:[%s531_s0 + $0x8] sm:$0xff]  ;;  %v19_v1 = vld [vmem:[%s531_s0] sm:$0xff]  ;;  %v21_v8 = vld [vmem:[%s531_s0 + $0x10] sm:$0xf]  ;;  %s385_s23 = smov 110   ;;  %s386_s0 = smov 96   ;;  %295 = vmatprep.mubr.bf16.mxu0 %v390_v25  ;;  %336 = vmatprep.mubr.bf16.mxu1 %v390_v25 }
   0x2   :  { %v423_v2 = vpack.c.bf16 %v20_v0, %v20_v0  ;;  %v425_v3 = vpack.c.bf16 %v19_v1, %v19_v1  ;;  %v25_v4 = vcombine.high %v20_v0, %v20_v0  ;;  %v24_v5 = vcombine.high %v19_v1, %v19_v1  ;;  %s387_s24 = smov 95   ;;  %s388_s25 = smov 127   ;;  %380 = vset.pattern.permute.xlu0 %v390_v25  ;;  %v241_v26 = vld [vmem:[%s532_s2] sm:$0xff] }
   0x3   :  { %v32_v9 = vpack.c.bf16 %v21_v8, %v21_v8  ;;  %s389_s26 = smov 126   ;;  %s391_s27 = smov 112   ;;  %vm138_vm3 = vcmask 785408   ;;  %vm108_vm4 = vcmask 908288   ;;  %vm153_vm5 = vcmask 777216  }
   0x4   :  { %162 = vrot.lane.b32.xlu1 %v423_v2, %s383_s19  ;;  %158 = vrot.lane.b32.xlu0 %v425_v3, %s383_s19  ;;  %v429_v6 = vpack.c.bf16 %v25_v4, %v25_v4  ;;  %v431_v7 = vpack.c.bf16 %v24_v5, %v24_v5  ;;  %v40_v11 = vrot.slane %v423_v2, 6  ;;  %v38_v14 = vrot.slane %v425_v3, 6 }
   0x5   :  { %v42_v13 = vrot.slane %v32_v9, 6  ;;  %v60_v16 = vrot.slane %v423_v2, 4  ;;  %v62_v18 = vrot.slane %v32_v9, 4  ;;  %v58_v19 = vrot.slane %v425_v3, 4 }
   0x6   :  { %v39_v10 = vrot.slane %v431_v7, 6  ;;  %v41_v12 = vrot.slane %v429_v6, 6  ;;  %v59_v15 = vrot.slane %v431_v7, 4  ;;  %v61_v17 = vrot.slane %v429_v6, 4 }
   0x7   :  { %v79_v20 = vrot.slane %v431_v7, 2  ;;  %v80_v21 = vrot.slane %v423_v2, 2  ;;  %v81_v22 = vrot.slane %v429_v6, 2  ;;  %v82_v23 = vrot.slane %v32_v9, 2 }
   0x8   :  { %164 = vrot.lane.b32.xlu1 %v429_v6, %s383_s19  ;;  %160 = vrot.lane.b32.xlu0 %v431_v7, %s383_s19  ;;  %v78_v24 = vrot.slane %v425_v3, 2  ;;  %vm186_vm6 = vcmask 1043456   ;;  %vm195_vm7 = vcmask 1045504   ;;  %vm53_vm8 = vcmask 1039360  }
   0x9   :  { %vm73_vm9 = vcmask 1031168   ;;  %vm93_vm10 = vcmask 916480   ;;  %vm247_vm11 = vcmask 293888  }
   0xc   :  { %100 = vrot.lane.b32.xlu1 %v431_v7, %s384_s22  ;;  %166 = vrot.lane.b32.xlu0 %v32_v9, %s383_s19 }
  0x10   :  { %104 = vrot.lane.b32.xlu1 %v429_v6, %s384_s22  ;;  %102 = vrot.lane.b32.xlu0 %v423_v2, %s384_s22 }
  0x14   :  { %106 = vrot.lane.b32.xlu0 %v32_v9, %s384_s22  ;;  %115 = vrot.lane.b32.xlu1 %v39_v10, %s385_s23 }
  0x18   :  { %117 = vrot.lane.b32.xlu0 %v40_v11, %s385_s23  ;;  %119 = vrot.lane.b32.xlu1 %v41_v12, %s385_s23 }
  0x1c   :  { %121 = vrot.lane.b32.xlu0 %v42_v13, %s385_s23  ;;  %98 = vrot.lane.b32.xlu1 %v425_v3, %s384_s22 }
  0x20   :  { %113 = vrot.lane.b32.xlu0 %v38_v14, %s385_s23  ;;  %130 = vrot.lane.b32.xlu1 %v59_v15, %s386_s0 }
  0x24   :  { %132 = vrot.lane.b32.xlu0 %v60_v16, %s386_s0  ;;  %134 = vrot.lane.b32.xlu1 %v61_v17, %s386_s0 }
  0x28   :  { %136 = vrot.lane.b32.xlu0 %v62_v18, %s386_s0  ;;  %128 = vrot.lane.b32.xlu1 %v58_v19, %s386_s0 }
  0x2c   :  { %145 = vrot.lane.b32.xlu0 %v79_v20, %s387_s24  ;;  %147 = vrot.lane.b32.xlu1 %v80_v21, %s387_s24 }
  0x30   :  { %149 = vrot.lane.b32.xlu0 %v81_v22, %s387_s24  ;;  %151 = vrot.lane.b32.xlu1 %v82_v23, %s387_s24 }
  0x34   :  { %143 = vrot.lane.b32.xlu0 %v78_v24, %s387_s24  ;;  %45 = vrot.lane.b32.xlu1 %v39_v10, %s388_s25 }
  0x38   :  { %47 = vrot.lane.b32.xlu0 %v40_v11, %s388_s25  ;;  %49 = vrot.lane.b32.xlu1 %v41_v12, %s388_s25 }
  0x3c   :  { %51 = vrot.lane.b32.xlu0 %v42_v13, %s388_s25  ;;  %43 = vrot.lane.b32.xlu1 %v38_v14, %s388_s25 }
  0x40   :  { %65 = vrot.lane.b32.xlu0 %v59_v15, %s389_s26  ;;  %67 = vrot.lane.b32.xlu1 %v60_v16, %s389_s26 }
  0x44   :  { %69 = vrot.lane.b32.xlu0 %v61_v17, %s389_s26  ;;  %71 = vrot.lane.b32.xlu1 %v62_v18, %s389_s26 }
  0x48   :  { %63 = vrot.lane.b32.xlu0 %v58_v19, %s389_s26  ;;  %85 = vrot.lane.b32.xlu1 %v79_v20, %s391_s27 }
  0x4c   :  { %87 = vrot.lane.b32.xlu0 %v80_v21, %s391_s27  ;;  %89 = vrot.lane.b32.xlu1 %v81_v22, %s391_s27 }
  0x50   :  { %91 = vrot.lane.b32.xlu0 %v82_v23, %s391_s27  ;;  %83 = vrot.lane.b32.xlu1 %v78_v24, %s391_s27 }
  0x54   :  { %244 = vperm.xlu0 %380, %v241_v26  }
  0x76   :  { %v163_v27 = vpop.permute.xlu1 %162  ;;  %v159_v28 = vpop.permute.xlu0 %158 }
  0x7a   :  { %v165_v29 = vpop.permute.xlu1 %164  ;;  %v161_v30 = vpop.permute.xlu0 %160 }
  0x7b   :  { %v170_v31 = vsel %vm168_vm0, %v161_v30, %v163_v27  ;;  %v169_v32 = vsel %vm168_vm0, %v159_v28, %v161_v30  ;;  %v171_v34 = vsel %vm168_vm0, %v163_v27, %v165_v29 }
  0x7c   :  { %367 = vmatprep.subr.msk.bf16.mxu0 %vm173_vm1, %v170_v31  ;;  %v252_v33 = vsel %vm173_vm1, %v169_v32, 0  ;;  %v258_v38 = vsel %vm173_vm1, %v171_v34, 0 }
  0x7d   :  { %274 = vmatpush1.bf16.msra.mxu0 %v252_v33 }
  0x7e   :  { %v101_v35 = vpop.permute.xlu1 %100  ;;  %v167_v36 = vpop.permute.xlu0 %166 }
  0x7f   :  { %v172_v37 = vsel %vm168_vm0, %v165_v29, %v167_v36 }
  0x80   :  { %369 = vmatprep.subr.msk.bf16.mxu1 %vm173_vm1, %v172_v37 }
  0x81   :  { %315 = vmatpush1.bf16.msra.mxu1 %v258_v38 }
  0x82   :  { %v105_v39 = vpop.permute.xlu1 %104  ;;  %v103_v40 = vpop.permute.xlu0 %102 }
  0x83   :  { %v110_v55 = vsel %vm108_vm4, %v101_v35, %v103_v40  ;;  %v111_v4 = vsel %vm108_vm4, %v103_v40, %v105_v39 }
  0x86   :  { %v107_v41 = vpop.permute.xlu0 %106  ;;  %v116_v42 = vpop.permute.xlu1 %115 }
  0x87   :  { %v112_v5 = vsel %vm108_vm4, %v105_v39, %v107_v41 }
  0x8a   :  { %v118_v43 = vpop.permute.xlu0 %117  ;;  %v120_v44 = vpop.permute.xlu1 %119 }
  0x8b   :  { %v125_v53 = vsel %vm123_vm2, %v116_v42, %v118_v43  ;;  %v126_v59 = vsel %vm123_vm2, %v118_v43, %v120_v44 }
  0x8c   :  { %v213_v56 = vsel %vm173_vm1, %v110_v55, %v125_v53  ;;  %v216_v8 = vsel %vm173_vm1, %v111_v4, %v126_v59 }
  0x8e   :  { %v122_v45 = vpop.permute.xlu0 %121  ;;  %v99_v46 = vpop.permute.xlu1 %98 }
  0x8f   :  { %v127_v60 = vsel %vm123_vm2, %v120_v44, %v122_v45  ;;  %v109_v20 = vsel %vm108_vm4, %v99_v46, %v101_v35 }
  0x90   :  { %v219_v9 = vsel %vm173_vm1, %v112_v5, %v127_v60 }
  0x92   :  { %v114_v47 = vpop.permute.xlu0 %113  ;;  %v131_v48 = vpop.permute.xlu1 %130 }
  0x93   :  { %v124_v10 = vsel %vm123_vm2, %v114_v47, %v116_v42 }
  0x94   :  { %v210_v21 = vsel %vm173_vm1, %v109_v20, %v124_v10 }
  0x96   :  { %v133_v49 = vpop.permute.xlu0 %132  ;;  %v135_v50 = vpop.permute.xlu1 %134 }
  0x97   :  { %v140_v54 = vsel %vm138_vm3, %v131_v48, %v133_v49  ;;  %v141_v63 = vsel %vm138_vm3, %v133_v49, %v135_v50 }
  0x98   :  { %v223_v62 = vsel %vm186_vm6, %v213_v56, %v140_v54  ;;  %v225_v16 = vsel %vm186_vm6, %v216_v8, %v141_v63 }
  0x9a   :  { %v137_v51 = vpop.permute.xlu0 %136  ;;  %v129_v52 = vpop.permute.xlu1 %128 }
  0x9b   :  { %v142_v0 = vsel %vm138_vm3, %v135_v50, %v137_v51  ;;  %v139_v17 = vsel %vm138_vm3, %v129_v52, %v131_v48 }
  0x9c   :  { %v227_v15 = vsel %vm186_vm6, %v219_v9, %v142_v0  ;;  %v221_v25 = vsel %vm186_vm6, %v210_v21, %v139_v17  ;;  %v350_v0 = vstv %s534_s3 }
  0x9e   :  { %v146_v57 = vpop.permute.xlu0 %145  ;;  %v148_v58 = vpop.permute.xlu1 %147 }
  0x9f   :  { %v155_v61 = vsel %vm153_vm5, %v146_v57, %v148_v58 }
  0xa0   :  { %v232_v1 = vsel %vm195_vm7, %v223_v62, %v155_v61  ;;  %v240_v61 = vld [vmem:[%s533_s1] sm:$0xf] }
  0xa1   :  { %275 = vmatprep.subr.bf16.mxu0 %v232_v1 }
  0xa2   :  { %v150_v11 = vpop.permute.xlu0 %149  ;;  %v152_v12 = vpop.permute.xlu1 %151 }
  0xa3   :  { %v156_v13 = vsel %vm153_vm5, %v148_v58, %v150_v11  ;;  %v157_v14 = vsel %vm153_vm5, %v150_v11, %v152_v12 }
  0xa4   :  { %v238_v18 = vsel %vm195_vm7, %v227_v15, %v157_v14  ;;  %v235_v19 = vsel %vm195_vm7, %v225_v16, %v156_v13 }
  0xa5   :  { %316 = vmatprep.subr.bf16.mxu1 %v238_v18 }
  0xa6   :  { %v144_v22 = vpop.permute.xlu0 %143  ;;  %317 = vmatpush1.bf16.msra.mxu1 %v235_v19  ;;  %v46_v23 = vpop.permute.xlu1 %45 }
  0xa7   :  { %v154_v24 = vsel %vm153_vm5, %v144_v22, %v146_v57 }
  0xa8   :  { %v229_v26 = vsel %vm195_vm7, %v221_v25, %v154_v24 }
  0xa9   :  { %276 = vmatpush1.bf16.msra.mxu0 %v229_v26 }
  0xaa   :  { %v48_v27 = vpop.permute.xlu0 %47  ;;  %v50_v28 = vpop.permute.xlu1 %49 }
  0xab   :  { %v55_v37 = vsel %vm53_vm8, %v46_v23, %v48_v27  ;;  %v56_v40 = vsel %vm53_vm8, %v48_v27, %v50_v28 }
  0xac   :  { %v179_v39 = vsel %vm173_vm1, %v431_v7, %v55_v37  ;;  %v182_v7 = vsel %vm173_vm1, %v423_v2, %v56_v40 }
  0xae   :  { %v52_v29 = vpop.permute.xlu0 %51  ;;  %v44_v30 = vpop.permute.xlu1 %43 }
  0xaf   :  { %v57_v43 = vsel %vm53_vm8, %v50_v28, %v52_v29  ;;  %v54_v44 = vsel %vm53_vm8, %v44_v30, %v46_v23 }
  0xb0   :  { %v185_v51 = vsel %vm173_vm1, %v429_v6, %v57_v43  ;;  %v176_v52 = vsel %vm173_vm1, %v425_v3, %v54_v44 }
  0xb2   :  { %v66_v31 = vpop.permute.xlu0 %65  ;;  %v68_v32 = vpop.permute.xlu1 %67 }
  0xb3   :  { %v75_v38 = vsel %vm73_vm9, %v66_v31, %v68_v32 }
  0xb4   :  { %v190_v46 = vsel %vm186_vm6, %v179_v39, %v75_v38 }
  0xb6   :  { %v70_v33 = vpop.permute.xlu0 %69  ;;  %v72_v34 = vpop.permute.xlu1 %71 }
  0xb7   :  { %v77_v47 = vsel %vm73_vm9, %v70_v33, %v72_v34  ;;  %v76_v50 = vsel %vm73_vm9, %v68_v32, %v70_v33 }
  0xb8   :  { %v194_v59 = vsel %vm186_vm6, %v185_v51, %v77_v47  ;;  %v192_v6 = vsel %vm186_vm6, %v182_v7, %v76_v50 }
  0xba   :  { %v64_v35 = vpop.permute.xlu0 %63  ;;  %v86_v36 = vpop.permute.xlu1 %85 }
  0xbb   :  { %v74_v48 = vsel %vm73_vm9, %v64_v35, %v66_v31 }
  0xbc   :  { %v188_v58 = vsel %vm186_vm6, %v176_v52, %v74_v48 }
  0xbe   :  { %v88_v41 = vpop.permute.xlu0 %87  ;;  %v90_v42 = vpop.permute.xlu1 %89 }
  0xbf   :  { %v95_v45 = vsel %vm93_vm10, %v86_v36, %v88_v41  ;;  %v96_v53 = vsel %vm93_vm10, %v88_v41, %v90_v42 }
  0xc0   :  { %v200_v49 = vsel %vm195_vm7, %v190_v46, %v95_v45  ;;  %v203_v3 = vsel %vm195_vm7, %v192_v6, %v96_v53 }
  0xc1   :  { %277 = vmatprep.subr.bf16.mxu0 %v200_v49 }
  0xc2   :  { %v92_v54 = vpop.permute.xlu0 %91  ;;  %v84_v55 = vpop.permute.xlu1 %83 }
  0xc3   :  { %v97_v56 = vsel %vm93_vm10, %v90_v42, %v92_v54  ;;  %v94_v57 = vsel %vm93_vm10, %v84_v55, %v86_v36 }
  0xc4   :  { %v197_v2 = vsel %vm195_vm7, %v188_v58, %v94_v57  ;;  %v206_v60 = vsel %vm195_vm7, %v194_v59, %v97_v56 }
  0xc5   :  { %278 = vmatpush1.bf16.msra.mxu0 %v197_v2  ;;  %318 = vmatprep.subr.bf16.mxu1 %v206_v60 }
  0xc6   :  { %319 = vmatpush1.bf16.msra.mxu1 %v203_v3 }
  0xc8   :  { %368 = vmatmul.mubr.msk.bf16.vlgmr.msra.gmra.mxu0 %vm247_vm11, %v240_v61 }
  0xc9   :  { %370 = vmatmul.mubr.msk.bf16.vlgmr.msra.gmra.mxu1 %vm247_vm11, %v240_v61 }
  0xcf   :  { %v245_v62 = vpop.permute.xlu0 %244 }
 0x188   :  { %v297_v63 = vpop.f32.mrf.mxu0 }
 0x189   :  { %v298_v1 = vadd.f32 %v297_v63, %v245_v62  ;;  %v338_v4 = vpop.f32.mrf.mxu1 }
 0x18a   :  { %v339_v5 = vadd.f32 %v338_v4, %v245_v62  ;;  %v299_v8 = vpop.f32.mrf.mxu0 }
 0x18b   :  { %vm346_vm12 = vcmp.gt.f32.partialorder %v298_v1, 0.0  ;;  %v351_v9 = vmul.f32 %v350_v0, %v298_v1  ;;  %v300_v10 = vadd.f32 %v299_v8, %v245_v62  ;;  %v340_v11 = vpop.f32.mrf.mxu1 }
 0x18c   :  { %vm348_vm13 = vcmp.gt.f32.partialorder %v339_v5, 0.0  ;;  %v353_v12 = vmul.f32 %v350_v0, %v339_v5  ;;  %v341_v13 = vadd.f32 %v340_v11, %v245_v62  ;;  %v301_v14 = vpop.f32.mrf.mxu0 }
 0x18d   :  { %v355_v15 = vsel %vm346_vm12, %v298_v1, %v351_v9  ;;  %vm347_vm14 = vcmp.gt.f32.partialorder %v300_v10, 0.0  ;;  %v352_v16 = vmul.f32 %v350_v0, %v300_v10  ;;  %v342_v17 = vpop.f32.mrf.mxu1 }
 0x18e   :  { %359 = vst [vmem:[%s535_s4] sm:$0xff] %v355_v15  ;;  %v357_v18 = vsel %vm348_vm13, %v339_v5, %v353_v12  ;;  %vm349_vm15 = vcmp.gt.f32.partialorder %v341_v13, 0.0  ;;  %v354_v19 = vmul.f32 %v350_v0, %v341_v13  ;;  %v302_v20 = vpop.f32.mrf.mxu0 }
 0x18f   :  { %361 = vst [vmem:[%s535_s4 + $0x10] sm:$0xff] %v357_v18  ;;  %v356_v21 = vsel %vm347_vm14, %v300_v10, %v352_v16  ;;  %v343_v22 = vpop.f32.mrf.mxu1 }
 0x190   :  { %360 = vst [vmem:[%s535_s4 + $0x8] sm:$0xff] %v356_v21  ;;  %v358_v23 = vsel %vm349_vm15, %v341_v13, %v354_v19 }
 0x191   :  { %362 = vst [vmem:[%s535_s4 + $0x18] sm:$0xff] %v358_v23 }

</bundles_post_ra>
